<compile_context>
chip_gen: v7x
topology: tpu7x:2x2x1
jax: 0.10.0
libtpu: 0.0.40
codegen_flags: <defaults>
</compile_context>

<pallas_src>
import functools

import jax
import jax.numpy as jnp
from jax.experimental import pallas as pl
from jax.experimental.pallas import tpu as pltpu


def _round_up(v, m):
    return ((v + m - 1) // m) * m


def _round_down(v, m):
    return (v // m) * m


def _linear_kernel(x_ref, w_ref, b_ref, o_ref, *, r, p):
    # x_ref: (tm, r*p) VMEM, w_ref: (1, r*p) VMEM, b_ref: (1,1) SMEM,
    # o_ref: (tm, r) VMEM.
    x = x_ref[...].astype(jnp.float32)
    w = w_ref[...].astype(jnp.float32)          # (1, r*p) broadcasts over rows
    prod = x * w                                # VPU elementwise
    if r == 1:
        acc = jnp.sum(prod, axis=-1, keepdims=True)            # (tm, 1)
    else:
        # Segmented lane reduce: lanes [j*p, (j+1)*p) hold logical row j of the
        # packed row. Static slices -> XLU lane reduces -> lane-denser (tm, r).
        acc = jnp.concatenate(
            [jnp.sum(prod[:, j * p:(j + 1) * p], axis=-1, keepdims=True)
             for j in range(r)],
            axis=-1,
        )
    o_ref[...] = (acc + b_ref[0, 0]).astype(o_ref.dtype)


def regression_forward(x, w, b, *, target_block_bytes=4 * 1024 * 1024):
    """x: (N, p); w: (1, p) as in nn.Linear(p, 1); b: (1,). Returns (N, 1)."""
    N, p = x.shape
    dtype = x.dtype
    itemsize = jnp.dtype(dtype).itemsize

    # Dtype-aware sublane multiple: 8 for f32, 16 for bf16, 32 for int8/fp8.
    sub = {4: 8, 2: 16, 1: 32}.get(itemsize, 8)

    # --- Lane packing: r logical rows per 128-lane group when p divides 128 ---
    r = 128 // p if (p < 128 and 128 % p == 0) else 1
    N_pad = _round_up(N, r)
    if N_pad != N:
        x = jnp.pad(x, ((0, N_pad - N), (0, 0)))
    n_rows = N_pad // r                      # packed row count
    cols = r * p                             # packed row width (lanes)
    x_packed = x.reshape(n_rows, cols)       # contiguous reshape: free
    w_row = jnp.asarray(w).reshape(1, p)
    w_packed = jnp.tile(w_row, (1, r)) if r > 1 else w_row
    b2d = jnp.asarray(b).reshape(1, 1)

    # --- Row-tile sizing: target ~target_block_bytes of x HBM bytes per step ---
    hbm_row_bytes = cols * itemsize
    tm = max(sub, _round_down(target_block_bytes // hbm_row_bytes, sub))

    # Keep >= ~8 grid blocks when N permits (v7x megacore split + pipelining).
    tm = min(tm, max(sub, _round_up(pl.cdiv(n_rows, 8), sub)))

    # VMEM budget with 128-lane padding and double buffering for x and out,
    # plus the resident (double-buffered) w tile. Stay under ~40 MiB so the
    # explicit 48 MiB scoped limit below is safe even on v7x (64 MiB physical).
    vmem_budget = 40 * 1024 * 1024
    lane_cols = _round_up(cols, 128)
    out_cols = _round_up(r, 128)
    w_vmem = 2 * sub * lane_cols * itemsize
    per_row_vmem = 2 * lane_cols * itemsize + 2 * out_cols * itemsize
    max_tm_vmem = _round_down(max(sub, (vmem_budget - w_vmem) // per_row_vmem), sub)
    tm = min(tm, max_tm_vmem)

    if tm >= n_rows:
        tm = n_rows                          # single full-extent block (small N)
    grid = (pl.cdiv(n_rows, tm),)

    # If per-step DMAs are tiny but there are several steps, deepen the pipeline.
    x_block_bytes = tm * cols * itemsize
    if grid[0] > 1 and x_block_bytes < (1 << 20):
        x_spec = pl.BlockSpec((tm, cols), lambda i: (i, 0),
                              pipeline_mode=pl.Buffered(3))
    else:
        x_spec = pl.BlockSpec((tm, cols), lambda i: (i, 0))

    cost = pl.CostEstimate(
        flops=2 * N * p,
        transcendentals=0,
        bytes_accessed=(N_pad * cols * itemsize      # x
                        + cols * itemsize            # w
                        + n_rows * r * itemsize      # out
                        + itemsize),                 # bias
    )

    kernel = functools.partial(_linear_kernel, r=r, p=p)

    out = pl.pallas_call(
        kernel,
        out_shape=jax.ShapeDtypeStruct((n_rows, r), dtype),
        grid=grid,
        in_specs=[
            x_spec,                                              # x rows stream
            pl.BlockSpec((1, cols), lambda i: (0, 0)),           # w resident
            pl.BlockSpec(memory_space=pltpu.MemorySpace.SMEM),   # bias scalar
        ],
        out_specs=pl.BlockSpec((tm, r), lambda i: (i, 0)),
        compiler_params=pltpu.CompilerParams(
            dimension_semantics=("parallel",),
            vmem_limit_bytes=48 * 1024 * 1024,
        ),
        cost_estimate=cost,
    )(x_packed, w_packed, b2d)

    y = out.reshape(N_pad, 1)
    if N_pad != N:
        y = y[:N]
    return y


if __name__ == "__main__":
    p = 32      # feature dimension
    N = 16      # batch size

    key = jax.random.PRNGKey(0)
    kx, kw, kb = jax.random.split(key, 3)

    # Deterministic parameters mirroring nn.Linear(p, 1) shapes:
    # weight (1, p), bias (1,), uniform(-1/sqrt(p), 1/sqrt(p)).
    bound = 1.0 / (p ** 0.5)
    w = jax.random.uniform(kw, (1, p), jnp.float32, -bound, bound)
    b = jax.random.uniform(kb, (1,), jnp.float32, -bound, bound)

    x = jax.random.normal(kx, (N, p), jnp.float32)

    y = regression_forward(x, w, b)
    y = jax.block_until_ready(y)

    # Correctness check against plain-JAX reference of the PyTorch forward.
    y_ref = x @ w.T + b
    assert y.shape == (N, 1), y.shape
    assert jnp.allclose(y, y_ref, atol=1e-5, rtol=1e-5)

    print("KERNEL_OK")
</pallas_src>

<mosaic_0001>
module attributes {stable_mosaic.version = 11 : i64} {
  func.func @_linear_kernel(%arg0: i32, %arg1: memref<4x128xf32, #tpu.memory_space<vmem>>, %arg2: memref<1x128xf32, #tpu.memory_space<vmem>>, %arg3: memref<1x1xf32, #tpu.memory_space<smem>>, %arg4: memref<4x4xf32, #tpu.memory_space<vmem>>) attributes {dimension_semantics = [#tpu.dimension_semantics<parallel>], iteration_bounds = array<i64: 1>, scalar_prefetch = 0 : i64, scratch_operands = 0 : i64, tpu.core_type = #tpu.core_type<tc>, window_params = [{transform_indices = @transform_0, window_bounds = array<i64: 4, 128>}, {pipeline_mode = #tpu.pipeline_mode<synchronous>, transform_indices = @transform_1, window_bounds = array<i64: 1, 128>}, {transform_indices = @transform_2, window_bounds = array<i64: 1, 1>}, {transform_indices = @transform_3, window_bounds = array<i64: 4, 4>}]} {
    %c0 = arith.constant 0 : index
    %c0_0 = arith.constant 0 : index
    %0 = vector.load %arg1[%c0, %c0_0] : memref<4x128xf32, #tpu.memory_space<vmem>>, vector<4x128xf32>
    %c0_1 = arith.constant 0 : index
    %c0_2 = arith.constant 0 : index
    %1 = vector.load %arg2[%c0_1, %c0_2] : memref<1x128xf32, #tpu.memory_space<vmem>>, vector<1x128xf32>
    %2 = vector.broadcast %1 : vector<1x128xf32> to vector<4x128xf32>
    %3 = arith.mulf %0, %2 : vector<4x128xf32>
    %4 = vector.extract_strided_slice %3 {offsets = [0, 0], sizes = [4, 32], strides = [1, 1]} : vector<4x128xf32> to vector<4x32xf32>
    %cst = arith.constant dense<0.000000e+00> : vector<4xf32>
    %5 = vector.multi_reduction <add>, %4, %cst [1] : vector<4x32xf32> to vector<4xf32>
    %6 = vector.shape_cast %5 : vector<4xf32> to vector<4x1xf32>
    %7 = vector.extract_strided_slice %3 {offsets = [0, 32], sizes = [4, 32], strides = [1, 1]} : vector<4x128xf32> to vector<4x32xf32>
    %cst_3 = arith.constant dense<0.000000e+00> : vector<4xf32>
    %8 = vector.multi_reduction <add>, %7, %cst_3 [1] : vector<4x32xf32> to vector<4xf32>
    %9 = vector.shape_cast %8 : vector<4xf32> to vector<4x1xf32>
    %10 = vector.extract_strided_slice %3 {offsets = [0, 64], sizes = [4, 32], strides = [1, 1]} : vector<4x128xf32> to vector<4x32xf32>
    %cst_4 = arith.constant dense<0.000000e+00> : vector<4xf32>
    %11 = vector.multi_reduction <add>, %10, %cst_4 [1] : vector<4x32xf32> to vector<4xf32>
    %12 = vector.shape_cast %11 : vector<4xf32> to vector<4x1xf32>
    %13 = vector.extract_strided_slice %3 {offsets = [0, 96], sizes = [4, 32], strides = [1, 1]} : vector<4x128xf32> to vector<4x32xf32>
    %cst_5 = arith.constant dense<0.000000e+00> : vector<4xf32>
    %14 = vector.multi_reduction <add>, %13, %cst_5 [1] : vector<4x32xf32> to vector<4xf32>
    %15 = vector.shape_cast %14 : vector<4xf32> to vector<4x1xf32>
    %16 = tpu.concatenate %6, %9, %12, %15 in 1 : vector<4x1xf32>, vector<4x1xf32>, vector<4x1xf32>, vector<4x1xf32> -> vector<4x4xf32>
    %c0_6 = arith.constant 0 : index
    %c0_7 = arith.constant 0 : index
    %17 = memref.load %arg3[%c0_6, %c0_7] : memref<1x1xf32, #tpu.memory_space<smem>>
    %18 = vector.broadcast %17 : f32 to vector<4x4xf32>
    %19 = arith.addf %16, %18 : vector<4x4xf32>
    %c0_8 = arith.constant 0 : index
    %c0_9 = arith.constant 0 : index
    %20 = vector.load %arg4[%c0_8, %c0_9] : memref<4x4xf32, #tpu.memory_space<vmem>>, vector<4x4xf32>
    tpu.vector_store %arg4[%c0_8, %c0_9], %19 {strides = array<i32>} : memref<4x4xf32, #tpu.memory_space<vmem>>, vector<4x4xf32>,
    return
  }
  func.func @transform_0(%arg0: i32) -> (i32, i32) {
    %c0_i32 = arith.constant 0 : i32
    %c0_i32_0 = arith.constant 0 : i32
    return %arg0, %c0_i32 : i32, i32
  }
  func.func @transform_1(%arg0: i32) -> (i32, i32) {
    %c0_i32 = arith.constant 0 : i32
    %c0_i32_0 = arith.constant 0 : i32
    %c0_i32_1 = arith.constant 0 : i32
    return %c0_i32, %c0_i32_0 : i32, i32
  }
  func.func @transform_2(%arg0: i32) -> (i32, i32) {
    %c0_i32 = arith.constant 0 : i32
    %c0_i32_0 = arith.constant 0 : i32
    %c0_i32_1 = arith.constant 0 : i32
    return %c0_i32, %c0_i32_0 : i32, i32
  }
  func.func @transform_3(%arg0: i32) -> (i32, i32) {
    %c0_i32 = arith.constant 0 : i32
    %c0_i32_0 = arith.constant 0 : i32
    return %arg0, %c0_i32 : i32, i32
  }
}

</mosaic_0001>

<bundles_post_ra>
// kernel: tpu_custom_call.1
= control target key start
LH: loop header
LB: loop body
LE: loop exit
PB: predicated region body
PF: predicated region fallthrough
CT: control target
= control target key end

     0   :  { %9 = vsyncpa [#allocation4], 0  ;;  %s195_s0 = inlined_call_operand.hbm [shape: f32[4,128], index: 0, kind: input, shape index: {}]   ;;  %s196_s1 = inlined_call_operand.vmem [shape: f32[1,128], index: 1, kind: input, shape index: {}]   ;;  %s197_s2 = inlined_call_operand.<no memory space> [shape: f32[1,1], index: 2, kind: input, shape index: {}]   ;;  %s198_s3 = inlined_call_operand.hbm [shape: f32[4,4], index: 3, kind: output, shape index: {}]  }
   0x1   :  { %10 = vsyncpa [#allocation5], 0  ;;  %s140_s12 = smov [#allocation3]   ;;  %s92_s16 = scalar_lea.hbm %s195_s0, 64 }
   0x2   :  { %s17_s13 = sshll.u32 %s140_s12, 4  ;;  %p93_p0 = scmp.ne.s32.totalorder %s195_s0, %s92_s16  ;;  %s18_s13 = int_to_ptr.vmem [resolvable:$true] %s17_s13 }
   0x3   :  { %p96_p1 = scmp.lt.u32.totalorder %s92_s16, %s195_s0 }
   0x5   :  { %p98_p2 = pnand %p96_p1, %p93_p0 }
   0x7   :  { %101 = shalt.err (!%p98_p2)
}
   0x8   :  { %s102_s21 = scalar_lea.vmem %s18_s13, 64  ;;  %p107_p4 = scmp.lt.s32.totalorder %s18_s13, %s18_s13 }
   0x9   :  { %p103_p3 = scmp.ne.s32.totalorder %s18_s13, %s102_s21  ;;  %p108_p5 = scmp.lt.s32.totalorder %s102_s21, %s102_s21 }
   0xb   :  { %p109_p6 = por %p108_p5, %p107_p4 }
   0xd   :  { %p110_p7 = pnand %p109_p6, %p103_p3 }
   0xf   :  { %113 = shalt.err (!%p110_p7)
}
  0x10   :  { %20 = dma.hbm_to_vmem [thread:$0]  %s195_s0, 64, %s18_s13, [#allocation4]  }
  0x11   :  { %136 = dma.done.wait [#allocation4], 64  }
  0x12   :  { %137 = vsyncadd [#allocation4], 4294967232  ;;  %v28_v0 = vld [vmem:[#allocation3] sm:$0xf]  ;;  %s141_s26 = smov 96   ;;  %s142_s27 = smov 32   ;;  %v67_v15 = vstv %s197_s2 }
  0x13   :  { %v86_v1 = vld [vmem:[%s196_s1] ss:$0 sm:$0xff]  ;;  %s143_s28 = smov 64   ;;  %vm37_vm0 = vcmask 257024   ;;  %vm60_vm1 = vcmask 7168   ;;  %vm62_vm2 = vcmask 15360  }
  0x14   :  { %v36_v2 = vmul.f32 %v86_v1, %v28_v0  ;;  %vm64_vm3 = vcmask 23552   ;;  %s144_s29 = smov [#allocation6]   ;;  %vm69_vm4 = vcmask 27648  }
  0x15   :  { %s77_s30 = sshll.u32 %s144_s29, 4  ;;  %s78_s30 = int_to_ptr.vmem [resolvable:$true] %s77_s30 }
  0x16   :  { %42 = vrot.lane.b32.xlu0 %v36_v2, %s141_s26  ;;  %54 = vrot.lane.b32.xlu1 %v36_v2, %s142_s27  ;;  %v38_v3 = vsel %vm37_vm0, %v36_v2, 0.0  ;;  %s114_s4 = scalar_lea.vmem %s78_s30, 64  ;;  %p119_p9 = scmp.lt.s32.totalorder %s78_s30, %s78_s30 }
  0x17   :  { %p115_p8 = scmp.ne.s32.totalorder %s78_s30, %s114_s4  ;;  %p120_p10 = scmp.lt.s32.totalorder %s114_s4, %s114_s4 }
  0x19   :  { %p121_p11 = por %p120_p10, %p119_p9 }
  0x1a   :  { %48 = vrot.lane.b32.xlu0 %v36_v2, %s143_s28 }
  0x1b   :  { %p122_p12 = pnand %p121_p11, %p115_p8 }
  0x3a   :  { %39 = vadd.xlane.f32.xlu1 %v38_v3 }
  0x88   :  { %v43_v4 = vpop.permute.xlu0 %42  ;;  %v55_v5 = vpop.permute.xlu1 %54 }
  0x89   :  { %v45_v6 = vsel %vm37_vm0, %v43_v4, 0.0  ;;  %v57_v7 = vsel %vm37_vm0, %v55_v5, 0.0 }
  0x8a   :  { %46 = vadd.xlane.f32.xlu0 %v45_v6  ;;  %58 = vadd.xlane.f32.xlu1 %v57_v7 }
  0x8c   :  { %v49_v8 = vpop.permute.xlu0 %48 }
  0x8d   :  { %v51_v9 = vsel %vm37_vm0, %v49_v8, 0.0 }
  0x8e   :  { %52 = vadd.xlane.f32.xlu0 %v51_v9 }
  0xc7   :  { %v40_v10 = vpop.xlane.xlu1 %39 }
 0x117   :  { %v47_v11 = vpop.xlane.xlu0 %46  ;;  %v59_v12 = vpop.xlane.xlu1 %58 }
 0x118   :  { %v61_v13 = vsel %vm60_vm1, %v40_v10, %v47_v11 }
 0x11b   :  { %v53_v14 = vpop.xlane.xlu0 %52 }
 0x11c   :  { %v63_v16 = vsel %vm62_vm2, %v61_v13, %v53_v14 }
 0x11d   :  { %v65_v17 = vsel %vm64_vm3, %v63_v16, %v59_v12 }
 0x11e   :  { %v68_v18 = vadd.f32 %v67_v15, %v65_v17 }
 0x120   :  { %70 = vst.msk [vmem:[#allocation6] sm:$0xf] %vm69_vm4, %v68_v18 }
 0x121   :  { %125 = shalt.err (!%p122_p12)
}
 0x122   :  { %s126_s7 = scalar_lea.hbm %s198_s3, 64 }
 0x123   :  { %p127_p13 = scmp.ne.s32.totalorder %s198_s3, %s126_s7  ;;  %p130_p0 = scmp.lt.u32.totalorder %s126_s7, %s198_s3 }
 0x125   :  { %p132_p1 = pnand %p130_p0, %p127_p13 }
 0x127   :  { %135 = shalt.err (!%p132_p1)
}
 0x128   :  { %80 = dma.vmem_to_hbm [thread:$0]  %s78_s30, 64, %s198_s3, [#allocation5]  }
 0x129   :  { %138 = dma.done.wait [#allocation5], 64  }
 0x12a   :  { %139 = vsyncadd [#allocation5], 4294967232 }
 0x12b   :  { %84 = vsyncpa [#allocation4], 1 }
 0x12c   :  { %85 = vsyncpa [#allocation5], 1 }

</bundles_post_ra>
